<compile_context>
chip_gen: v7x
topology: tpu7x:2x2x1
jax: 0.10.0
libtpu: 0.0.40
codegen_flags: <defaults>
</compile_context>

<pallas_src>
import functools

import jax
import jax.numpy as jnp
from jax.experimental import pallas as pl
from jax.experimental.pallas import tpu as pltpu

_LANE = 128   # lane quantum (last dim)


def _round_up(x, m):
    return (x + m - 1) // m * m


# ----------------------------------------------------------------------------
# Activations (pure jnp; shared by the kernel body and the reference)
# ----------------------------------------------------------------------------
def _apply_activation(y, activation, a, inv_a):
    if activation is None:
        return y
    if activation == "tanh":
        return jnp.tanh(y)
    if activation == "relu":
        return jnp.maximum(y, 0.0)
    if activation == "sin":
        return jnp.sin(y)
    if activation == "sin_plus_cos":
        return jnp.sin(y) + jnp.cos(y)
    if activation == "snake":            # x + sin(a*x)^2 / a  (1/a precomputed)
        s = jnp.sin(a * y)
        return y + (s * s) * inv_a
    if activation == "x_sin":
        return y + jnp.sin(y)
    raise Exception("Unknown activation")


def _parse_activation(hidden_activation, snake_a=1.0):
    """Map the PyTorch activation string to (name, a). `a` may be a runtime scalar."""
    if hidden_activation is None:
        return None, 1.0
    if hidden_activation == "learned_snake":
        return "snake", snake_a          # runtime (possibly learned) alpha
    if hidden_activation[:5] == "snake":
        a = 1.0 if hidden_activation == "snake" else float(hidden_activation[8:])
        return "snake", a
    return hidden_activation, 1.0


# ----------------------------------------------------------------------------
# Fused whole-MLP kernel
# ----------------------------------------------------------------------------
def _mlp_fused_kernel(*refs, n_layers, activation, use_bf16):
    # refs = (alpha_smem, x_ref, w0, b0, w1, b1, ..., w_{L-1}, b_{L-1}, o_ref)
    alpha_ref, x_ref, o_ref = refs[0], refs[1], refs[-1]
    wb = refs[2:-1]

    if activation == "snake":
        a, inv_a = alpha_ref[0], alpha_ref[1]    # runtime SMEM scalars [a, 1/a]
    else:
        a = inv_a = 1.0

    mx_dtype = jnp.bfloat16 if use_bf16 else jnp.float32
    h = x_ref[...]                                # (TM, Din) in the upstream dtype
    for k in range(n_layers):
        w = wb[2 * k][...]                        # already bf16 when use_bf16
        bias = wb[2 * k + 1][...]                 # (1, Dout) f32
        # bf16 MXU inputs, f32 accumulate; bias + activation stay in f32.
        y = jnp.dot(h.astype(mx_dtype), w, preferred_element_type=jnp.float32) + bias
        if k < n_layers - 1:
            y = _apply_activation(y, activation, a, inv_a)
        h = y
    o_ref[...] = h.astype(o_ref.dtype)


def _pick_batch_tile(batch, batch_tile, sub_q):
    if batch % sub_q != 0 and batch <= batch_tile:
        # Whole batch as one block via the full-dim exception: no pad, no masking.
        return batch
    # Tiled path: tile is a multiple of the sublane quantum; aim for >= 2 grid steps
    # so the second TensorCore (v7x) gets work; a ragged last block is mask-stored.
    tm = min(batch_tile, _round_up(pl.cdiv(batch, 2), sub_q))
    return max(tm, sub_q)


def mlp_fused(x2d, padded_params, alpha_arr, activation, use_bf16, batch_tile=256):
    """One pallas_call for the entire MLP. Weights stay VMEM-resident across tiles."""
    batch, din = x2d.shape
    n_layers = len(padded_params)
    d_out = padded_params[-1][0].shape[1]         # natural width (last layer unpadded)

    sub_q = 16 if x2d.dtype == jnp.bfloat16 else 8
    tm = _pick_batch_tile(batch, batch_tile, sub_q)
    grid = (pl.cdiv(batch, tm),)

    kernel = functools.partial(
        _mlp_fused_kernel, n_layers=n_layers, activation=activation, use_bf16=use_bf16)

    flat_wb = [t for pair in padded_params for t in pair]

    # VMEM footprint: single-buffered weights/biases + double-buffered x/out blocks
    # + a few live f32 intermediates.  2x margin, clamped to [16 MiB, 64 MiB]
    # (v7x has 64 MiB per TensorCore).
    w_bytes = sum(w.size * w.dtype.itemsize + b.size * b.dtype.itemsize
                  for (w, b) in padded_params)
    widths = [din] + [w.shape[1] for (w, _) in padded_params]
    est = (w_bytes
           + 2 * tm * din * x2d.dtype.itemsize
           + 2 * tm * d_out * 4
           + 3 * tm * max(widths) * 4)
    vmem_limit = int(min(max(2 * est, 16 << 20), 64 << 20))

    def build(single_buffer_weights):
        extra = {"pipeline_mode": pl.Buffered(1)} if single_buffer_weights else {}
        wb_specs = []
        for (w, b) in padded_params:
            # Constant index_map -> weights/biases stay VMEM-resident across tiles.
            wb_specs.append(pl.BlockSpec(w.shape, lambda i: (0, 0), **extra))
            wb_specs.append(pl.BlockSpec(b.shape, lambda i: (0, 0), **extra))
        in_specs = (
            [pl.BlockSpec(memory_space=pltpu.MemorySpace.SMEM)]      # [a, 1/a]
            + [pl.BlockSpec((tm, din), lambda i: (i, 0))]            # x tile
            + wb_specs)
        return pl.pallas_call(
            kernel,
            out_shape=jax.ShapeDtypeStruct((batch, d_out), jnp.float32),
            grid=grid,
            in_specs=in_specs,
            out_specs=pl.BlockSpec((tm, d_out), lambda i: (i, 0)),
            compiler_params=pltpu.CompilerParams(
                dimension_semantics=("parallel",),   # batch axis -> v7x 2-TC split
                vmem_limit_bytes=vmem_limit,
            ),
        )

    try:
        return build(True)(alpha_arr, x2d, *flat_wb)
    except Exception:
        # pl.Buffered(1) unsupported on this jax/Mosaic build -> default buffering.
        return build(False)(alpha_arr, x2d, *flat_wb)


# ----------------------------------------------------------------------------
# SimpleMLP wrapper
# ----------------------------------------------------------------------------
def init_simple_mlp_params(key, layer_sizes):
    """Deterministic nn.Linear-style init. Weights stored transposed (in, out)."""
    params = []
    for k in range(len(layer_sizes) - 1):
        d_in, d_out = layer_sizes[k], layer_sizes[k + 1]
        key, kw, kb = jax.random.split(key, 3)
        bound = 1.0 / jnp.sqrt(d_in)
        w_t = jax.random.uniform(kw, (d_in, d_out), jnp.float32, -bound, bound)
        b = jax.random.uniform(kb, (1, d_out), jnp.float32, -bound, bound)
        params.append((w_t, b))
    return params


def _pad_params(params, use_bf16):
    """Zero-pad hidden dims to the 128-lane quantum; the first layer's d_in and the
    last layer's d_out stay natural (x / output use the full-dim BlockSpec exception).
    Padded d_in rows of the NEXT layer are zero so nonzero padded-lane activation
    values (e.g. sin_plus_cos(0)=1) are annihilated -- preserve this invariant if the
    layout changes.  Weights are pre-cast to bf16 ONCE here (biases stay f32)."""
    w_dtype = jnp.bfloat16 if use_bf16 else jnp.float32
    n = len(params)
    padded = []
    for k, (w, b) in enumerate(params):
        d_in, d_out = w.shape
        d_in_p = d_in if k == 0 else _round_up(d_in, _LANE)
        d_out_p = d_out if k == n - 1 else _round_up(d_out, _LANE)
        w_p = jnp.pad(w.astype(jnp.float32),
                      ((0, d_in_p - d_in), (0, d_out_p - d_out))).astype(w_dtype)
        b_p = jnp.pad(b.astype(jnp.float32), ((0, 0), (0, d_out_p - d_out)))
        padded.append((w_p, b_p))
    return padded


def simple_mlp_forward(x, params, hidden_activation="snake", snake_a=1.0,
                       use_bf16_matmul=True, batch_tile=256):
    # nn.Flatten(): (B, ...) -> (B, prod). Keep the upstream dtype (no wrapper upcast).
    x2d = x.reshape(x.shape[0], -1)
    act, a = _parse_activation(hidden_activation, snake_a)
    a_val = jnp.asarray(a, jnp.float32).reshape(())
    alpha_arr = jnp.stack([a_val, 1.0 / a_val])          # runtime SMEM scalars [a, 1/a]
    padded_params = _pad_params(params, use_bf16_matmul)
    return mlp_fused(x2d, padded_params, alpha_arr, act, use_bf16_matmul, batch_tile)


# Pure-JAX reference (same bf16-in / f32-accumulate convention as the kernel).
def simple_mlp_ref(x, params, hidden_activation="snake", snake_a=1.0,
                   use_bf16_matmul=True):
    x = x.reshape(x.shape[0], -1).astype(jnp.float32)
    act, a = _parse_activation(hidden_activation, snake_a)
    a = jnp.asarray(a, jnp.float32)
    n_layers = len(params)
    for k, (w_t, b) in enumerate(params):
        if use_bf16_matmul:
            y = jnp.dot(x.astype(jnp.bfloat16), w_t.astype(jnp.bfloat16),
                        preferred_element_type=jnp.float32) + b
        else:
            y = x @ w_t + b
        if k < n_layers - 1:
            y = _apply_activation(y, act, a, 1.0 / a)
        x = y
    return x


if __name__ == "__main__":
    key = jax.random.PRNGKey(0)
    k_x, k_p = jax.random.split(key)

    # Input shaped like an NCHW image; Flatten -> 4*4*4 = 64 features.
    x = jax.random.normal(k_x, (2, 4, 4, 4), jnp.float32)

    layer_sizes = [64, 32, 32, 16]
    params = init_simple_mlp_params(k_p, layer_sizes)

    # snake hidden activation
    out = jax.block_until_ready(simple_mlp_forward(x, params, hidden_activation="snake"))
    ref = simple_mlp_ref(x, params, hidden_activation="snake")
    assert out.shape == (2, 16), out.shape
    assert jnp.allclose(out, ref, atol=2e-4, rtol=2e-4), "snake mismatch vs reference"

    # tanh through the same fused kernel
    out_t = jax.block_until_ready(simple_mlp_forward(x, params, hidden_activation="tanh"))
    ref_t = simple_mlp_ref(x, params, hidden_activation="tanh")
    assert jnp.allclose(out_t, ref_t, atol=2e-4, rtol=2e-4), "tanh mismatch vs reference"

    # learned_snake with a runtime alpha: exercises the SMEM scalar path (no recompile
    # when the learned parameter changes, since it is a runtime array, not a constant).
    alpha = jnp.float32(0.75)
    out_ls = jax.block_until_ready(
        simple_mlp_forward(x, params, hidden_activation="learned_snake", snake_a=alpha))
    ref_ls = simple_mlp_ref(x, params, hidden_activation="learned_snake", snake_a=alpha)
    assert jnp.allclose(out_ls, ref_ls, atol=2e-4, rtol=2e-4), "learned_snake mismatch"

    print("KERNEL_OK")
</pallas_src>

<mosaic_0001>
module attributes {stable_mosaic.version = 11 : i64} {
  func.func @_mlp_fused_kernel(%arg0: i32, %arg1: memref<2xf32, #tpu.memory_space<smem>>, %arg2: memref<2x64xf32, #tpu.memory_space<vmem>>, %arg3: memref<64x128xbf16, #tpu.memory_space<vmem>>, %arg4: memref<1x128xf32, #tpu.memory_space<vmem>>, %arg5: memref<128x128xbf16, #tpu.memory_space<vmem>>, %arg6: memref<1x128xf32, #tpu.memory_space<vmem>>, %arg7: memref<128x16xbf16, #tpu.memory_space<vmem>>, %arg8: memref<1x16xf32, #tpu.memory_space<vmem>>, %arg9: memref<2x16xf32, #tpu.memory_space<vmem>>) attributes {dimension_semantics = [#tpu.dimension_semantics<parallel>], iteration_bounds = array<i64: 1>, scalar_prefetch = 0 : i64, scratch_operands = 0 : i64, tpu.core_type = #tpu.core_type<tc>, window_params = [{transform_indices = @transform_0, window_bounds = array<i64: 2>}, {transform_indices = @transform_1, window_bounds = array<i64: 2, 64>}, {pipeline_mode = #tpu.pipeline_mode<synchronous>, transform_indices = @transform_2, window_bounds = array<i64: 64, 128>}, {pipeline_mode = #tpu.pipeline_mode<synchronous>, transform_indices = @transform_3, window_bounds = array<i64: 1, 128>}, {pipeline_mode = #tpu.pipeline_mode<synchronous>, transform_indices = @transform_4, window_bounds = array<i64: 128, 128>}, {pipeline_mode = #tpu.pipeline_mode<synchronous>, transform_indices = @transform_5, window_bounds = array<i64: 1, 128>}, {pipeline_mode = #tpu.pipeline_mode<synchronous>, transform_indices = @transform_6, window_bounds = array<i64: 128, 16>}, {pipeline_mode = #tpu.pipeline_mode<synchronous>, transform_indices = @transform_7, window_bounds = array<i64: 1, 16>}, {transform_indices = @transform_8, window_bounds = array<i64: 2, 16>}]} {
    %c0 = arith.constant 0 : index
    %0 = memref.load %arg1[%c0] : memref<2xf32, #tpu.memory_space<smem>>
    %c1 = arith.constant 1 : index
    %1 = memref.load %arg1[%c1] : memref<2xf32, #tpu.memory_space<smem>>
    %c0_0 = arith.constant 0 : index
    %c0_1 = arith.constant 0 : index
    %2 = vector.load %arg2[%c0_0, %c0_1] : memref<2x64xf32, #tpu.memory_space<vmem>>, vector<2x64xf32>
    %c0_2 = arith.constant 0 : index
    %c0_3 = arith.constant 0 : index
    %3 = vector.load %arg3[%c0_2, %c0_3] : memref<64x128xbf16, #tpu.memory_space<vmem>>, vector<64x128xbf16>
    %c0_4 = arith.constant 0 : index
    %c0_5 = arith.constant 0 : index
    %4 = vector.load %arg4[%c0_4, %c0_5] : memref<1x128xf32, #tpu.memory_space<vmem>>, vector<1x128xf32>
    %5 = arith.truncf %2 : vector<2x64xf32> to vector<2x64xbf16>
    %cst = arith.constant dense<0.000000e+00> : vector<2x128xf32>
    %6 = tpu.matmul %5, %3, %cst {dimension_numbers = #tpu.dot_dimension_numbers<[1], [0], [0], [1], [0, 0, 1, 1], [], []>} : vector<2x64xbf16>, vector<64x128xbf16>, vector<2x128xf32> -> vector<2x128xf32>
    %7 = vector.broadcast %4 : vector<1x128xf32> to vector<2x128xf32>
    %8 = arith.addf %6, %7 : vector<2x128xf32>
    %9 = vector.broadcast %0 : f32 to vector<2x128xf32>
    %10 = arith.mulf %9, %8 : vector<2x128xf32>
    %11 = math.sin %10 : vector<2x128xf32>
    %12 = arith.mulf %11, %11 : vector<2x128xf32>
    %13 = vector.broadcast %1 : f32 to vector<2x128xf32>
    %14 = arith.mulf %12, %13 : vector<2x128xf32>
    %15 = arith.addf %8, %14 : vector<2x128xf32>
    %c0_6 = arith.constant 0 : index
    %c0_7 = arith.constant 0 : index
    %16 = vector.load %arg5[%c0_6, %c0_7] : memref<128x128xbf16, #tpu.memory_space<vmem>>, vector<128x128xbf16>
    %c0_8 = arith.constant 0 : index
    %c0_9 = arith.constant 0 : index
    %17 = vector.load %arg6[%c0_8, %c0_9] : memref<1x128xf32, #tpu.memory_space<vmem>>, vector<1x128xf32>
    %18 = arith.truncf %15 : vector<2x128xf32> to vector<2x128xbf16>
    %cst_10 = arith.constant dense<0.000000e+00> : vector<2x128xf32>
    %19 = tpu.matmul %18, %16, %cst_10 {dimension_numbers = #tpu.dot_dimension_numbers<[1], [0], [0], [1], [0, 0, 1, 1], [], []>} : vector<2x128xbf16>, vector<128x128xbf16>, vector<2x128xf32> -> vector<2x128xf32>
    %20 = vector.broadcast %17 : vector<1x128xf32> to vector<2x128xf32>
    %21 = arith.addf %19, %20 : vector<2x128xf32>
    %22 = vector.broadcast %0 : f32 to vector<2x128xf32>
    %23 = arith.mulf %22, %21 : vector<2x128xf32>
    %24 = math.sin %23 : vector<2x128xf32>
    %25 = arith.mulf %24, %24 : vector<2x128xf32>
    %26 = vector.broadcast %1 : f32 to vector<2x128xf32>
    %27 = arith.mulf %25, %26 : vector<2x128xf32>
    %28 = arith.addf %21, %27 : vector<2x128xf32>
    %c0_11 = arith.constant 0 : index
    %c0_12 = arith.constant 0 : index
    %29 = vector.load %arg7[%c0_11, %c0_12] : memref<128x16xbf16, #tpu.memory_space<vmem>>, vector<128x16xbf16>
    %c0_13 = arith.constant 0 : index
    %c0_14 = arith.constant 0 : index
    %30 = vector.load %arg8[%c0_13, %c0_14] : memref<1x16xf32, #tpu.memory_space<vmem>>, vector<1x16xf32>
    %31 = arith.truncf %28 : vector<2x128xf32> to vector<2x128xbf16>
    %cst_15 = arith.constant dense<0.000000e+00> : vector<2x16xf32>
    %32 = tpu.matmul %31, %29, %cst_15 {dimension_numbers = #tpu.dot_dimension_numbers<[1], [0], [0], [1], [0, 0, 1, 1], [], []>} : vector<2x128xbf16>, vector<128x16xbf16>, vector<2x16xf32> -> vector<2x16xf32>
    %33 = vector.broadcast %30 : vector<1x16xf32> to vector<2x16xf32>
    %34 = arith.addf %32, %33 : vector<2x16xf32>
    %c0_16 = arith.constant 0 : index
    %c0_17 = arith.constant 0 : index
    %35 = vector.load %arg9[%c0_16, %c0_17] : memref<2x16xf32, #tpu.memory_space<vmem>>, vector<2x16xf32>
    tpu.vector_store %arg9[%c0_16, %c0_17], %34 {strides = array<i32>} : memref<2x16xf32, #tpu.memory_space<vmem>>, vector<2x16xf32>,
    return
  }
  func.func @transform_0(%arg0: i32) -> i32 {
    %c0_i32 = arith.constant 0 : i32
    %c0_i32_0 = arith.constant 0 : i32
    return %c0_i32 : i32
  }
  func.func @transform_1(%arg0: i32) -> (i32, i32) {
    %c0_i32 = arith.constant 0 : i32
    %c0_i32_0 = arith.constant 0 : i32
    return %arg0, %c0_i32 : i32, i32
  }
  func.func @transform_2(%arg0: i32) -> (i32, i32) {
    %c0_i32 = arith.constant 0 : i32
    %c0_i32_0 = arith.constant 0 : i32
    %c0_i32_1 = arith.constant 0 : i32
    return %c0_i32, %c0_i32_0 : i32, i32
  }
  func.func @transform_3(%arg0: i32) -> (i32, i32) {
    %c0_i32 = arith.constant 0 : i32
    %c0_i32_0 = arith.constant 0 : i32
    %c0_i32_1 = arith.constant 0 : i32
    return %c0_i32, %c0_i32_0 : i32, i32
  }
  func.func @transform_4(%arg0: i32) -> (i32, i32) {
    %c0_i32 = arith.constant 0 : i32
    %c0_i32_0 = arith.constant 0 : i32
    %c0_i32_1 = arith.constant 0 : i32
    return %c0_i32, %c0_i32_0 : i32, i32
  }
  func.func @transform_5(%arg0: i32) -> (i32, i32) {
    %c0_i32 = arith.constant 0 : i32
    %c0_i32_0 = arith.constant 0 : i32
    %c0_i32_1 = arith.constant 0 : i32
    return %c0_i32, %c0_i32_0 : i32, i32
  }
  func.func @transform_6(%arg0: i32) -> (i32, i32) {
    %c0_i32 = arith.constant 0 : i32
    %c0_i32_0 = arith.constant 0 : i32
    %c0_i32_1 = arith.constant 0 : i32
    return %c0_i32, %c0_i32_0 : i32, i32
  }
  func.func @transform_7(%arg0: i32) -> (i32, i32) {
    %c0_i32 = arith.constant 0 : i32
    %c0_i32_0 = arith.constant 0 : i32
    %c0_i32_1 = arith.constant 0 : i32
    return %c0_i32, %c0_i32_0 : i32, i32
  }
  func.func @transform_8(%arg0: i32) -> (i32, i32) {
    %c0_i32 = arith.constant 0 : i32
    %c0_i32_0 = arith.constant 0 : i32
    return %arg0, %c0_i32 : i32, i32
  }
}

module attributes {stable_mosaic.version = 11 : i64} {
  func.func @_mlp_fused_kernel(%arg0: i32, %arg1: memref<2xf32, #tpu.memory_space<smem>>, %arg2: memref<2x64xf32, #tpu.memory_space<vmem>>, %arg3: memref<64x128xbf16, #tpu.memory_space<vmem>>, %arg4: memref<1x128xf32, #tpu.memory_space<vmem>>, %arg5: memref<128x128xbf16, #tpu.memory_space<vmem>>, %arg6: memref<1x128xf32, #tpu.memory_space<vmem>>, %arg7: memref<128x16xbf16, #tpu.memory_space<vmem>>, %arg8: memref<1x16xf32, #tpu.memory_space<vmem>>, %arg9: memref<2x16xf32, #tpu.memory_space<vmem>>) attributes {dimension_semantics = [#tpu.dimension_semantics<parallel>], iteration_bounds = array<i64: 1>, scalar_prefetch = 0 : i64, scratch_operands = 0 : i64, tpu.core_type = #tpu.core_type<tc>, window_params = [{transform_indices = @transform_0, window_bounds = array<i64: 2>}, {transform_indices = @transform_1, window_bounds = array<i64: 2, 64>}, {pipeline_mode = #tpu.pipeline_mode<synchronous>, transform_indices = @transform_2, window_bounds = array<i64: 64, 128>}, {pipeline_mode = #tpu.pipeline_mode<synchronous>, transform_indices = @transform_3, window_bounds = array<i64: 1, 128>}, {pipeline_mode = #tpu.pipeline_mode<synchronous>, transform_indices = @transform_4, window_bounds = array<i64: 128, 128>}, {pipeline_mode = #tpu.pipeline_mode<synchronous>, transform_indices = @transform_5, window_bounds = array<i64: 1, 128>}, {pipeline_mode = #tpu.pipeline_mode<synchronous>, transform_indices = @transform_6, window_bounds = array<i64: 128, 16>}, {pipeline_mode = #tpu.pipeline_mode<synchronous>, transform_indices = @transform_7, window_bounds = array<i64: 1, 16>}, {transform_indices = @transform_8, window_bounds = array<i64: 2, 16>}]} {
    %c0 = arith.constant 0 : index
    %0 = memref.load %arg1[%c0] : memref<2xf32, #tpu.memory_space<smem>>
    %c1 = arith.constant 1 : index
    %1 = memref.load %arg1[%c1] : memref<2xf32, #tpu.memory_space<smem>>
    %c0_0 = arith.constant 0 : index
    %c0_1 = arith.constant 0 : index
    %2 = vector.load %arg2[%c0_0, %c0_1] : memref<2x64xf32, #tpu.memory_space<vmem>>, vector<2x64xf32>
    %c0_2 = arith.constant 0 : index
    %c0_3 = arith.constant 0 : index
    %3 = vector.load %arg3[%c0_2, %c0_3] : memref<64x128xbf16, #tpu.memory_space<vmem>>, vector<64x128xbf16>
    %c0_4 = arith.constant 0 : index
    %c0_5 = arith.constant 0 : index
    %4 = vector.load %arg4[%c0_4, %c0_5] : memref<1x128xf32, #tpu.memory_space<vmem>>, vector<1x128xf32>
    %5 = arith.truncf %2 : vector<2x64xf32> to vector<2x64xbf16>
    %cst = arith.constant dense<0.000000e+00> : vector<2x128xf32>
    %6 = tpu.matmul %5, %3, %cst {dimension_numbers = #tpu.dot_dimension_numbers<[1], [0], [0], [1], [0, 0, 1, 1], [], []>} : vector<2x64xbf16>, vector<64x128xbf16>, vector<2x128xf32> -> vector<2x128xf32>
    %7 = vector.broadcast %4 : vector<1x128xf32> to vector<2x128xf32>
    %8 = arith.addf %6, %7 : vector<2x128xf32>
    %9 = vector.broadcast %0 : f32 to vector<2x128xf32>
    %10 = arith.mulf %9, %8 : vector<2x128xf32>
    %11 = math.sin %10 : vector<2x128xf32>
    %12 = arith.mulf %11, %11 : vector<2x128xf32>
    %13 = vector.broadcast %1 : f32 to vector<2x128xf32>
    %14 = arith.mulf %12, %13 : vector<2x128xf32>
    %15 = arith.addf %8, %14 : vector<2x128xf32>
    %c0_6 = arith.constant 0 : index
    %c0_7 = arith.constant 0 : index
    %16 = vector.load %arg5[%c0_6, %c0_7] : memref<128x128xbf16, #tpu.memory_space<vmem>>, vector<128x128xbf16>
    %c0_8 = arith.constant 0 : index
    %c0_9 = arith.constant 0 : index
    %17 = vector.load %arg6[%c0_8, %c0_9] : memref<1x128xf32, #tpu.memory_space<vmem>>, vector<1x128xf32>
    %18 = arith.truncf %15 : vector<2x128xf32> to vector<2x128xbf16>
    %cst_10 = arith.constant dense<0.000000e+00> : vector<2x128xf32>
    %19 = tpu.matmul %18, %16, %cst_10 {dimension_numbers = #tpu.dot_dimension_numbers<[1], [0], [0], [1], [0, 0, 1, 1], [], []>} : vector<2x128xbf16>, vector<128x128xbf16>, vector<2x128xf32> -> vector<2x128xf32>
    %20 = vector.broadcast %17 : vector<1x128xf32> to vector<2x128xf32>
    %21 = arith.addf %19, %20 : vector<2x128xf32>
    %22 = vector.broadcast %0 : f32 to vector<2x128xf32>
    %23 = arith.mulf %22, %21 : vector<2x128xf32>
    %24 = math.sin %23 : vector<2x128xf32>
    %25 = arith.mulf %24, %24 : vector<2x128xf32>
    %26 = vector.broadcast %1 : f32 to vector<2x128xf32>
    %27 = arith.mulf %25, %26 : vector<2x128xf32>
    %28 = arith.addf %21, %27 : vector<2x128xf32>
    %c0_11 = arith.constant 0 : index
    %c0_12 = arith.constant 0 : index
    %29 = vector.load %arg7[%c0_11, %c0_12] : memref<128x16xbf16, #tpu.memory_space<vmem>>, vector<128x16xbf16>
    %c0_13 = arith.constant 0 : index
    %c0_14 = arith.constant 0 : index
    %30 = vector.load %arg8[%c0_13, %c0_14] : memref<1x16xf32, #tpu.memory_space<vmem>>, vector<1x16xf32>
    %31 = arith.truncf %28 : vector<2x128xf32> to vector<2x128xbf16>
    %cst_15 = arith.constant dense<0.000000e+00> : vector<2x16xf32>
    %32 = tpu.matmul %31, %29, %cst_15 {dimension_numbers = #tpu.dot_dimension_numbers<[1], [0], [0], [1], [0, 0, 1, 1], [], []>} : vector<2x128xbf16>, vector<128x16xbf16>, vector<2x16xf32> -> vector<2x16xf32>
    %33 = vector.broadcast %30 : vector<1x16xf32> to vector<2x16xf32>
    %34 = arith.addf %32, %33 : vector<2x16xf32>
    %c0_16 = arith.constant 0 : index
    %c0_17 = arith.constant 0 : index
    %35 = vector.load %arg9[%c0_16, %c0_17] : memref<2x16xf32, #tpu.memory_space<vmem>>, vector<2x16xf32>
    tpu.vector_store %arg9[%c0_16, %c0_17], %34 {strides = array<i32>} : memref<2x16xf32, #tpu.memory_space<vmem>>, vector<2x16xf32>,
    return
  }
  func.func @transform_0(%arg0: i32) -> i32 {
    %c0_i32 = arith.constant 0 : i32
    %c0_i32_0 = arith.constant 0 : i32
    return %c0_i32 : i32
  }
  func.func @transform_1(%arg0: i32) -> (i32, i32) {
    %c0_i32 = arith.constant 0 : i32
    %c0_i32_0 = arith.constant 0 : i32
    return %arg0, %c0_i32 : i32, i32
  }
  func.func @transform_2(%arg0: i32) -> (i32, i32) {
    %c0_i32 = arith.constant 0 : i32
    %c0_i32_0 = arith.constant 0 : i32
    %c0_i32_1 = arith.constant 0 : i32
    return %c0_i32, %c0_i32_0 : i32, i32
  }
  func.func @transform_3(%arg0: i32) -> (i32, i32) {
    %c0_i32 = arith.constant 0 : i32
    %c0_i32_0 = arith.constant 0 : i32
    %c0_i32_1 = arith.constant 0 : i32
    return %c0_i32, %c0_i32_0 : i32, i32
  }
  func.func @transform_4(%arg0: i32) -> (i32, i32) {
    %c0_i32 = arith.constant 0 : i32
    %c0_i32_0 = arith.constant 0 : i32
    %c0_i32_1 = arith.constant 0 : i32
    return %c0_i32, %c0_i32_0 : i32, i32
  }
  func.func @transform_5(%arg0: i32) -> (i32, i32) {
    %c0_i32 = arith.constant 0 : i32
    %c0_i32_0 = arith.constant 0 : i32
    %c0_i32_1 = arith.constant 0 : i32
    return %c0_i32, %c0_i32_0 : i32, i32
  }
  func.func @transform_6(%arg0: i32) -> (i32, i32) {
    %c0_i32 = arith.constant 0 : i32
    %c0_i32_0 = arith.constant 0 : i32
    %c0_i32_1 = arith.constant 0 : i32
    return %c0_i32, %c0_i32_0 : i32, i32
  }
  func.func @transform_7(%arg0: i32) -> (i32, i32) {
    %c0_i32 = arith.constant 0 : i32
    %c0_i32_0 = arith.constant 0 : i32
    %c0_i32_1 = arith.constant 0 : i32
    return %c0_i32, %c0_i32_0 : i32, i32
  }
  func.func @transform_8(%arg0: i32) -> (i32, i32) {
    %c0_i32 = arith.constant 0 : i32
    %c0_i32_0 = arith.constant 0 : i32
    return %arg0, %c0_i32 : i32, i32
  }
}

</mosaic_0001>

<bundles_post_ra>
// kernel: tpu_custom_call.1
= control target key start
LH: loop header
LB: loop body
LE: loop exit
PB: predicated region body
PF: predicated region fallthrough
CT: control target
= control target key end

     0   :  { %13 = vsyncpa [#allocation5], 0  ;;  %s1081_s0 = inlined_call_operand.vmem [shape: f32[2], index: 0, kind: input, shape index: {}]   ;;  %s1082_s1 = inlined_call_operand.vmem [shape: f32[2,64], index: 1, kind: input, shape index: {}]   ;;  %s1083_s2 = inlined_call_operand.hbm [shape: bf16[64,128], index: 2, kind: input, shape index: {}]   ;;  %s1084_s3 = inlined_call_operand.vmem [shape: f32[1,128], index: 3, kind: input, shape index: {}]   ;;  %s1085_s4 = inlined_call_operand.vmem [shape: bf16[128,128], index: 4, kind: input, shape index: {}]   ;;  %s1086_s5 = inlined_call_operand.vmem [shape: f32[1,128], index: 5, kind: input, shape index: {}]   ;;  %s1087_s6 = inlined_call_operand.vmem [shape: bf16[128,16], index: 6, kind: input, shape index: {}]   ;;  %s1088_s7 = inlined_call_operand.vmem [shape: f32[1,16], index: 7, kind: input, shape index: {}]   ;;  %s1089_s8 = inlined_call_operand.hbm [shape: f32[2,16], index: 8, kind: output, shape index: {}]  }
   0x1   :  { %14 = vsyncpa [#allocation3], 0 }
   0x2   :  { %15 = vsyncpa [#allocation4], 0  ;;  %s22_s29 = sshll.u32 %s1081_s0, 4  ;;  %s23_s29 = int_to_ptr.vmem [resolvable:$true] %s22_s29 }
   0x3   :  { %s762_s30 = scalar_lea.vmem %s23_s29, 16  ;;  %p767_p1 = scmp.lt.s32.totalorder %s23_s29, %s23_s29 }
   0x4   :  { %p763_p0 = scmp.ne.s32.totalorder %s23_s29, %s762_s30  ;;  %p768_p2 = scmp.lt.s32.totalorder %s762_s30, %s762_s30 }
   0x6   :  { %p769_p3 = por %p768_p2, %p767_p1 }
   0x8   :  { %p770_p4 = pnand %p769_p3, %p763_p0 }
   0xa   :  { %773 = shalt.err (!%p770_p4)
}
   0xb   :  { %s824_s9 = smov [#allocation2]   ;;  %s825_s10 = smov [#allocation6]  }
   0xc   :  { %25 = dma.vmem_to_smem %s23_s29, 16, %s824_s9, [#allocation5]  }
   0xd   :  { %s33_s11 = sshll.u32 %s825_s10, 4  ;;  %s774_s14 = scalar_lea.hbm %s1083_s2, 512  ;;  %s34_s11 = int_to_ptr.vmem [resolvable:$true] %s33_s11 }
   0xe   :  { %p775_p5 = scmp.ne.s32.totalorder %s1083_s2, %s774_s14  ;;  %p778_p6 = scmp.lt.u32.totalorder %s774_s14, %s1083_s2 }
  0x10   :  { %p780_p7 = pnand %p778_p6, %p775_p5 }
  0x12   :  { %783 = shalt.err (!%p780_p7)
}
  0x13   :  { %s784_s18 = scalar_lea.vmem %s34_s11, 512  ;;  %p789_p9 = scmp.lt.s32.totalorder %s34_s11, %s34_s11 }
  0x14   :  { %p785_p8 = scmp.ne.s32.totalorder %s34_s11, %s784_s18  ;;  %p790_p10 = scmp.lt.s32.totalorder %s784_s18, %s784_s18 }
  0x16   :  { %p791_p11 = por %p790_p10, %p789_p9 }
  0x18   :  { %p792_p12 = pnand %p791_p11, %p785_p8 }
  0x1a   :  { %795 = shalt.err (!%p792_p12)
}
  0x1b   :  { %s826_s19 = smov 64   ;;  %s827_s20 = smov 4  }
  0x1c   :  { %39 = dma.hbm_to_vmem [thread:$0]  %s1083_s2, 512, %s34_s11, [#allocation3], %s826_s19, %s826_s19, %s827_s20  }
  0x1d   :  { %818 = dma.done.wait [#allocation5], 16  }
  0x1e   :  { %819 = vsyncadd [#allocation5], 4294967280 }
  0x1f   :  { %820 = dma.done.wait [#allocation3], 512  }
  0x20   :  { %821 = vsyncadd [#allocation3], 4294966784 }
  0x21   :  { %56 = sfence }
  0x22   :  { %v734_v0 = vld [vmem:[#allocation6] sm:$0xff]   ;;  %v828_v1 = vmov 0.0   ;;  %v735_v2 = vld [vmem:[#allocation6 + $0x8] sm:$0xff]   ;;  %vm829_vm0 = vmmov 0   ;;  %v736_v3 = vld [vmem:[#allocation6 + $0x10] sm:$0xff]   ;;  %vm101_vm1 = vcmask 523264  }
  0x23   :  { %661 = vmatprep.subr.bf16.mxu0 %v828_v1  ;;  %673 = vmatprep.subr.bf16.mxu1 %v828_v1  ;;  %v737_v4 = vld [vmem:[#allocation6 + $0x18] sm:$0xff]   ;;  %v60_v5 = vld [vmem:[%s1082_s1] sm:$0x3]  ;;  %v739_v8 = vld [vmem:[%s1085_s4 + $0x8] sm:$0xff]   ;;  %s943_s0 = sld [smem:[#allocation2]]  ;;  %s836_s12 = smov [#allocation7]  }
  0x24   :  { %662 = vmatpush3.bf16.msra.mxu0 %v734_v0  ;;  %669 = vmatprep.mubr.msk.bf16.mxu0 %vm829_vm0, %v828_v1  ;;  %v70_v6 = vpack.c.bf16 %v60_v5, %v60_v5  ;;  %v738_v7 = vld [vmem:[%s1085_s4] sm:$0xff]   ;;  %v740_v9 = vld [vmem:[%s1085_s4 + $0x10] sm:$0xff]   ;;  %v741_v10 = vld [vmem:[%s1085_s4 + $0x18] sm:$0xff]   ;;  %v830_v33 = vmov 683565275   ;;  %s595_s13 = sshll.u32 %s836_s12, 4  ;;  %s596_s13 = int_to_ptr.vmem [resolvable:$true] %s595_s13 }
  0x25   :  { %663 = vmatprep.subr.bf16.mxu0 %v828_v1  ;;  %689 = vmatprep.mubr.msk.bf16.mxu1 %vm829_vm0, %v828_v1  ;;  %v742_v11 = vld [vmem:[%s1085_s4 + $0x20] sm:$0xff]   ;;  %v743_v12 = vld [vmem:[%s1085_s4 + $0x28] sm:$0xff]   ;;  %v744_v13 = vld [vmem:[%s1085_s4 + $0x30] sm:$0xff]   ;;  %v831_v35 = vmov 2475754826   ;;  %s796_s14 = scalar_lea.vmem %s596_s13, 32  ;;  %p801_p0 = scmp.lt.s32.totalorder %s596_s13, %s596_s13 }
  0x26   :  { %674 = vmatpush3.bf16.msra.mxu1 %v738_v7  ;;  %v745_v14 = vld [vmem:[%s1085_s4 + $0x38] sm:$0xff]   ;;  %v606_v15 = vld [vmem:[%s1084_s3] ss:$0 sm:$0xff]  ;;  %v832_v38 = vmov 2131351028   ;;  %s985_s3 = sld [smem:[#allocation2 + $0x1]]  ;;  %p797_p13 = scmp.ne.s32.totalorder %s596_s13, %s796_s14 }
  0x27   :  { %675 = vmatprep.subr.bf16.mxu1 %v828_v1  ;;  %v833_v41 = vmov 2102212464   ;;  %v834_v44 = vmov 920167782   ;;  %v835_v47 = vmov 1326507024   ;;  %p802_p1 = scmp.lt.s32.totalorder %s796_s14, %s796_s14 }
  0x28   :  { %664 = vmatpush3.bf16.msra.mxu0 %v735_v2 }
  0x29   :  { %665 = vmatprep.subr.bf16.mxu0 %v828_v1  ;;  %v145_v17 = vstv %s943_s0  ;;  %p803_p2 = por %p802_p1, %p801_p0 }
  0x2a   :  { %676 = vmatpush3.bf16.msra.mxu1 %v739_v8 }
  0x2b   :  { %677 = vmatprep.subr.bf16.mxu1 %v828_v1  ;;  %p804_p3 = pnand %p803_p2, %p797_p13 }
  0x2c   :  { %666 = vmatpush3.bf16.msra.mxu0 %v736_v3 }
  0x2d   :  { %667 = vmatprep.subr.bf16.mxu0 %v828_v1 }
  0x2e   :  { %678 = vmatpush3.bf16.msra.mxu1 %v740_v9 }
  0x2f   :  { %679 = vmatprep.subr.bf16.mxu1 %v828_v1 }
  0x30   :  { %668 = vmatpush3.bf16.msra.mxu0 %v737_v4 }
  0x31   :  { %693 = vmatprep.subr.bf16.mxu0 %v828_v1 }
  0x32   :  { %680 = vmatpush3.bf16.msra.mxu1 %v741_v10 }
  0x33   :  { %670 = vmatmul.mubr.msk.bf16.vlgmr.msra.gmra.mrb[0].mxu0 %vm101_vm1, %v70_v6  ;;  %681 = vmatprep.subr.bf16.mxu1 %v828_v1 }
  0x34   :  { %709 = vmatprep.mubr.msk.bf16.mxu0 %vm829_vm0, %v828_v1 }
  0x36   :  { %682 = vmatpush3.bf16.msra.mxu1 %v742_v11 }
  0x37   :  { %683 = vmatprep.subr.bf16.mxu1 %v828_v1 }
  0x3a   :  { %684 = vmatpush3.bf16.msra.mxu1 %v743_v12 }
  0x3b   :  { %685 = vmatprep.subr.bf16.mxu1 %v828_v1 }
  0x3e   :  { %686 = vmatpush3.bf16.msra.mxu1 %v744_v13 }
  0x3f   :  { %687 = vmatprep.subr.bf16.mxu1 %v828_v1 }
  0x42   :  { %688 = vmatpush3.bf16.msra.mxu1 %v745_v14 }
 0x106   :  { %v139_v16 = vpop.f32.mrb[0].mxu0 }
 0x107   :  { %v949_v18 = vadd.f32 %v606_v15, %v139_v16  ;;  %v671_v19 = vpop.f32.mrb[1].mxu0 }
 0x108   :  { %v142_v20 = vpop.f32.mrb[2].mxu0 }
 0x109   :  { %v954_v21 = vmul.f32 %v145_v17, %v949_v18  ;;  %v672_v22 = vpop.f32.mrb[3].mxu0 }
 0x10b   :  { %v150_v23 = vand.u32 2139095040, %v954_v21  ;;  %v147_v27 = vand.u32 2147483647, %v954_v21  ;;  %vm149_vm9 = vcmp.lt.s32.totalorder %v954_v21, 0  ;;  %vm239_vm14 = vweird.f32 %v954_v21 }
 0x10d   :  { %v151_v24 = vshrl.u32 %v150_v23, 23  ;;  %v154_v30 = vand.u32 8388607, %v147_v27  ;;  %vm148_vm10 = vcmp.le.f32.partialorder %v147_v27, 0.7853982 }
 0x10f   :  { %v612_v25 = vadd.s32 4294967169, %v151_v24  ;;  %v155_v49 = vor.u32 8388608, %v154_v30 }
 0x111   :  { %v157_v26 = vadd.s32 1, %v612_v25  ;;  %v195_v63 = vshll.u32 %v155_v49, 8 }
 0x113   :  { %vm158_vm2 = vcmp.gt.s32.totalorder %v157_v26, 0 }
 0x114   :  { %v159_v28 = vsel %vm158_vm2, %v157_v26, 0 }
 0x115   :  { %v161_v29 = vand.u32 31, %v159_v28  ;;  %v160_v32 = vshrl.u32 %v159_v28, 5 }
 0x117   :  { %v162_v31 = vsub.s32 32, %v161_v29  ;;  %v164_v34 = vshll.u32 %v830_v33, %v161_v29  ;;  %v167_v36 = vshll.u32 %v831_v35, %v161_v29  ;;  %v170_v40 = vshll.u32 %v832_v38, %v161_v29 }
 0x118   :  { %v173_v43 = vshll.u32 %v833_v41, %v161_v29  ;;  %v176_v46 = vshll.u32 %v834_v44, %v161_v29  ;;  %vm179_vm3 = vcmp.lt.s32.totalorder %v160_v32, 1  ;;  %vm182_vm4 = vcmp.lt.s32.totalorder %v160_v32, 4 }
 0x119   :  { %v165_v37 = vshrl.u32 %v831_v35, %v162_v31  ;;  %v168_v39 = vshrl.u32 %v832_v38, %v162_v31  ;;  %v171_v42 = vshrl.u32 %v833_v41, %v162_v31  ;;  %v174_v45 = vshrl.u32 %v834_v44, %v162_v31 }
 0x11a   :  { %v177_v48 = vshrl.u32 %v835_v47, %v162_v31  ;;  %v163_v58 = vshrl.u32 %v830_v33, %v162_v31  ;;  %vm181_vm5 = vcmp.lt.s32.totalorder %v160_v32, 3  ;;  %vm180_vm6 = vcmp.lt.s32.totalorder %v160_v32, 2 }
 0x11b   :  { %v166_v50 = vor.u32 %v165_v37, %v164_v34  ;;  %v169_v51 = vor.u32 %v168_v39, %v167_v36  ;;  %v172_v52 = vor.u32 %v171_v42, %v170_v40  ;;  %v175_v53 = vor.u32 %v174_v45, %v173_v43 }
 0x11c   :  { %v178_v54 = vor.u32 %v177_v48, %v176_v46 }
 0x11d   :  { %v184_v55 = vsel %vm182_vm4, %v172_v52, 2102212464  ;;  %v187_v56 = vsel %vm179_vm3, %v166_v50, %v169_v51  ;;  %v191_v57 = vsel %vm179_vm3, %v169_v51, %v172_v52  ;;  %v188_v59 = vsel %vm182_vm4, %v175_v53, 920167782 }
 0x11e   :  { %v192_v60 = vsel %vm182_vm4, %v178_v54, 1326507024  ;;  %v189_v61 = vsel %vm181_vm5, %v172_v52, %v188_v59  ;;  %v183_v0 = vsel %vm179_vm3, %v163_v58, %v166_v50  ;;  %v185_v2 = vsel %vm181_vm5, %v169_v51, %v184_v55 }
 0x11f   :  { %v193_v62 = vsel %vm181_vm5, %v175_v53, %v192_v60  ;;  %v190_v3 = vsel %vm180_vm6, %v187_v56, %v189_v61  ;;  %v186_v9 = vsel %vm180_vm6, %v183_v0, %v185_v2  ;;  %v252_v60 = vstv %s985_s3  ;;  %v746_v2 = vld [vmem:[%s1087_s6] sm:$0xff]  }
 0x120   :  { %v194_v4 = vsel %vm180_vm6, %v191_v57, %v193_v62  ;;  %v974_v7 = vmul.u32.u64.low %v195_v63, %v190_v3  ;;  %v975_v8 = vmul.u32.u64.high %v195_v63, %v190_v3, %v974_v7  ;;  %v202_v11 = vmul.u32 %v195_v63, %v186_v9  ;;  %694 = vmatpush3.bf16.msra.mxu0 %v746_v2  ;;  %v749_v3 = vld [vmem:[%s1087_s6 + $0x18] sm:$0xff]  }
 0x121   :  { %v971_v5 = vmul.u32.u64.low %v195_v63, %v194_v4  ;;  %v972_v6 = vmul.u32.u64.high %v195_v63, %v194_v4, %v971_v5  ;;  %695 = vmatprep.subr.bf16.mxu0 %v828_v1  ;;  %v750_v4 = vld [vmem:[%s1087_s6 + $0x20] sm:$0xff]  }
 0x122   :  { %v205_v10 = vadd.s32 1, %v975_v8  ;;  %v751_v5 = vld [vmem:[%s1087_s6 + $0x28] sm:$0xff]  }
 0x123   :  { %vm204_vm7 = vc.u32 %v972_v6, %v974_v7  ;;  %v203_v26 = vadd.s32 %v974_v7, %v972_v6  ;;  %v752_v6 = vld [vmem:[%s1087_s6 + $0x30] sm:$0xff]   ;;  %v753_v7 = vld [vmem:[%s1087_s6 + $0x38] sm:$0xff]  }
 0x124   :  { %v206_v12 = vsel %vm204_vm7, %v205_v10, %v975_v8  ;;  %v616_v8 = vld [vmem:[%s1086_s5] ss:$0 sm:$0xff] }
 0x125   :  { %v207_v13 = vadd.s32 %v206_v12, %v202_v11 }
 0x127   :  { %v208_v14 = vadd.s32 536870912, %v207_v13 }
 0x129   :  { %v209_v15 = vshrl.u32 %v208_v14, 30 }
 0x12b   :  { %v210_v16 = vshll.u32 %v209_v15, 30  ;;  %v233_v43 = vsub.s32 4, %v209_v15 }
 0x12d   :  { %v211_v19 = vsub.s32 %v207_v13, %v210_v16  ;;  %v234_v48 = vsel %vm149_vm9, %v233_v43, %v209_v15 }
 0x12e   :  { %v236_v50 = vsel %vm148_vm10, 0, %v234_v48 }
 0x12f   :  { %v213_v20 = vsub.s32 0, %v211_v19  ;;  %v240_v51 = vadd.s32 3, %v236_v50 }
 0x131   :  { %v613_v22 = vmin.u32 %v213_v20, %v211_v19  ;;  %v241_v52 = vand.u32 3, %v240_v51 }
 0x133   :  { %v215_v23 = vclz %v613_v22  ;;  %vm246_vm11 = vcmp.eq.s32.totalorder %v241_v52, 2  ;;  %vm243_vm12 = vcmp.eq.s32.totalorder %v241_v52, 0  ;;  %vm242_vm13 = vcmp.lt.s32.totalorder %v241_v52, 2 }
 0x135   :  { %v614_v24 = vadd.s32 4294967294, %v215_v23 }
 0x137   :  { %vm615_vm8 = vcmp.lt.s32.totalorder %v614_v24, 0 }
 0x138   :  { %v218_v25 = vsel %vm615_vm8, 0, %v614_v24 }
 0x139   :  { %v219_v28 = vsub.s32 32, %v218_v25  ;;  %v223_v29 = vsub.s32 4294967266, %v218_v25  ;;  %v220_v30 = vshll.u32 %v211_v19, %v218_v25 }
 0x13b   :  { %v221_v31 = vshrl.u32 %v203_v26, %v219_v28  ;;  %v224_v32 = vadd.s32 127, %v223_v29 }
 0x13d   :  { %v222_v34 = vor.u32 %v221_v31, %v220_v30  ;;  %v225_v36 = vshll.u32 %v224_v32, 23 }
 0x13f   :  { %v226_v37 = vor.u32 4788187, %v225_v36  ;;  %v229_v40 = vcvt.s32.f32 %v222_v34 }
 0x141   :  { %v227_v39 = vand.u32 2147483647, %v226_v37 }
 0x143   :  { %v230_v42 = vmul.f32 %v229_v40, %v227_v39 }
 0x145   :  { %v231_v45 = vxor.u32 2147483648, %v230_v42 }
 0x147   :  { %v232_v46 = vsel %vm149_vm9, %v231_v45, %v230_v42 }
 0x148   :  { %v235_v49 = vsel %vm148_vm10, %v954_v21, %v232_v46  ;;  %v747_v21 = vld [vmem:[%s1087_s6 + $0x8] sm:$0xff]  }
 0x149   :  { %754 = vcosq.f32 %v235_v49  ;;  %696 = vmatpush3.bf16.msra.mxu0 %v747_v21 }
 0x14a   :  { %756 = vsinq.f32 %v235_v49  ;;  %697 = vmatprep.subr.bf16.mxu0 %v828_v1 }
 0x153   :  { %v755_v53 = vpop.eup %754 }
 0x154   :  { %v757_v54 = vpop.eup %756  ;;  %v247_v55 = vxor.u32 2147483648, %v755_v53 }
 0x155   :  { %v244_v56 = vxor.u32 2147483648, %v757_v54 }
 0x156   :  { %v248_v27 = vsel %vm246_vm11, %v247_v55, %v757_v54 }
 0x157   :  { %v245_v57 = vsel %vm243_vm12, %v755_v53, %v244_v56  ;;  %vm587_vm12 = vcmask 123904  }
 0x158   :  { %v249_v58 = vsel %vm242_vm13, %v245_v57, %v248_v27 }
 0x159   :  { %v250_v59 = vsel %vm239_vm14, nan, %v249_v58 }
 0x15a   :  { %v251_v61 = vmul.f32 %v250_v59, %v250_v59 }
 0x15c   :  { %v253_v62 = vmul.f32 %v252_v60, %v251_v61 }
 0x15e   :  { %v254_v63 = vadd.f32 %v253_v62, %v949_v18  ;;  %v748_v18 = vld [vmem:[%s1087_s6 + $0x10] sm:$0xff]  }
 0x15f   :  { %698 = vmatpush3.bf16.msra.mxu0 %v748_v18 }
 0x160   :  { %v272_v0 = vpack.c.bf16 %v254_v63, %v254_v63  ;;  %699 = vmatprep.subr.bf16.mxu0 %v828_v1 }
 0x162   :  { %690 = vmatmul.mubr.bf16.vlgmr.msra.gmra.mrb[0].mxu1 %v272_v0 }
 0x163   :  { %700 = vmatpush3.bf16.msra.mxu0 %v749_v3 }
 0x164   :  { %701 = vmatprep.subr.bf16.mxu0 %v828_v1 }
 0x167   :  { %702 = vmatpush3.bf16.msra.mxu0 %v750_v4 }
 0x168   :  { %703 = vmatprep.subr.bf16.mxu0 %v828_v1 }
 0x16b   :  { %704 = vmatpush3.bf16.msra.mxu0 %v751_v5 }
 0x16c   :  { %705 = vmatprep.subr.bf16.mxu0 %v828_v1 }
 0x16f   :  { %706 = vmatpush3.bf16.msra.mxu0 %v752_v6 }
 0x170   :  { %707 = vmatprep.subr.bf16.mxu0 %v828_v1 }
 0x173   :  { %708 = vmatpush3.bf16.msra.mxu0 %v753_v7 }
 0x235   :  { %v361_v9 = vpop.f32.mrb[0].mxu1 }
 0x236   :  { %v1026_v10 = vadd.f32 %v616_v8, %v361_v9  ;;  %v691_v11 = vpop.f32.mrb[1].mxu1 }
 0x237   :  { %v364_v12 = vpop.f32.mrb[2].mxu1 }
 0x238   :  { %v1031_v13 = vmul.f32 %v1026_v10, %v145_v17  ;;  %v692_v14 = vpop.f32.mrb[3].mxu1 }
 0x23a   :  { %v371_v1 = vand.u32 2139095040, %v1031_v13  ;;  %v368_v20 = vand.u32 2147483647, %v1031_v13  ;;  %vm370_vm6 = vcmp.lt.s32.totalorder %v1031_v13, 0  ;;  %vm460_vm11 = vweird.f32 %v1031_v13 }
 0x23c   :  { %v372_v15 = vshrl.u32 %v371_v1, 23  ;;  %v375_v24 = vand.u32 8388607, %v368_v20  ;;  %vm369_vm7 = vcmp.le.f32.partialorder %v368_v20, 0.7853982 }
 0x23e   :  { %v625_v16 = vadd.s32 4294967169, %v372_v15  ;;  %v376_v40 = vor.u32 8388608, %v375_v24 }
 0x240   :  { %v378_v19 = vadd.s32 1, %v625_v16 }
 0x242   :  { %vm379_vm15 = vcmp.gt.s32.totalorder %v378_v19, 0 }
 0x243   :  { %v380_v22 = vsel %vm379_vm15, %v378_v19, 0 }
 0x244   :  { %v382_v23 = vand.u32 31, %v380_v22  ;;  %v381_v26 = vshrl.u32 %v380_v22, 5 }
 0x246   :  { %v383_v25 = vsub.s32 32, %v382_v23  ;;  %v385_v28 = vshll.u32 %v830_v33, %v382_v23  ;;  %v388_v17 = vshll.u32 %v831_v35, %v382_v23  ;;  %v391_v31 = vshll.u32 %v832_v38, %v382_v23 }
 0x247   :  { %v394_v34 = vshll.u32 %v833_v41, %v382_v23  ;;  %v397_v37 = vshll.u32 %v834_v44, %v382_v23  ;;  %vm400_vm0 = vcmp.lt.s32.totalorder %v381_v26, 1  ;;  %vm403_vm1 = vcmp.lt.s32.totalorder %v381_v26, 4 }
 0x248   :  { %v386_v29 = vshrl.u32 %v831_v35, %v383_v25  ;;  %v389_v30 = vshrl.u32 %v832_v38, %v383_v25  ;;  %v392_v32 = vshrl.u32 %v833_v41, %v383_v25  ;;  %v395_v36 = vshrl.u32 %v834_v44, %v383_v25 }
 0x249   :  { %v398_v39 = vshrl.u32 %v835_v47, %v383_v25  ;;  %v384_v50 = vshrl.u32 %v830_v33, %v383_v25  ;;  %vm402_vm2 = vcmp.lt.s32.totalorder %v381_v26, 3  ;;  %vm401_vm3 = vcmp.lt.s32.totalorder %v381_v26, 2 }
 0x24a   :  { %v387_v42 = vor.u32 %v386_v29, %v385_v28  ;;  %v390_v43 = vor.u32 %v389_v30, %v388_v17  ;;  %v393_v45 = vor.u32 %v392_v32, %v391_v31  ;;  %v396_v46 = vor.u32 %v395_v36, %v394_v34 }
 0x24b   :  { %v399_v35 = vor.u32 %v398_v39, %v397_v37  ;;  %v416_v47 = vshll.u32 %v376_v40, 8 }
 0x24c   :  { %v405_v48 = vsel %vm403_vm1, %v393_v45, 2102212464  ;;  %v408_v38 = vsel %vm400_vm0, %v387_v42, %v390_v43  ;;  %v412_v49 = vsel %vm400_vm0, %v390_v43, %v393_v45  ;;  %v409_v41 = vsel %vm403_vm1, %v396_v46, 920167782 }
 0x24d   :  { %v413_v51 = vsel %vm403_vm1, %v399_v35, 1326507024  ;;  %v410_v44 = vsel %vm402_vm2, %v393_v45, %v409_v41  ;;  %v404_v53 = vsel %vm400_vm0, %v384_v50, %v387_v42  ;;  %v406_v54 = vsel %vm402_vm2, %v390_v43, %v405_v48 }
 0x24e   :  { %v414_v52 = vsel %vm402_vm2, %v396_v46, %v413_v51  ;;  %v411_v55 = vsel %vm401_vm3, %v408_v38, %v410_v44  ;;  %v407_v61 = vsel %vm401_vm3, %v404_v53, %v406_v54 }
 0x24f   :  { %v415_v56 = vsel %vm401_vm3, %v412_v49, %v414_v52  ;;  %v1051_v58 = vmul.u32.u64.low %v416_v47, %v411_v55  ;;  %v1052_v59 = vmul.u32.u64.high %v416_v47, %v411_v55, %v1051_v58  ;;  %v423_v62 = vmul.u32 %v416_v47, %v407_v61  ;;  %v629_v49 = vld [vmem:[%s1088_s7] ss:$0 sm:$0xff] }
 0x250   :  { %v1048_v27 = vmul.u32.u64.low %v416_v47, %v415_v56  ;;  %v1049_v57 = vmul.u32.u64.high %v416_v47, %v415_v56, %v1048_v27 }
 0x251   :  { %v426_v33 = vadd.s32 1, %v1052_v59 }
 0x252   :  { %vm425_vm4 = vc.u32 %v1049_v57, %v1051_v58  ;;  %v424_v9 = vadd.s32 %v1051_v58, %v1049_v57 }
 0x253   :  { %v427_v63 = vsel %vm425_vm4, %v426_v33, %v1052_v59 }
 0x254   :  { %v428_v0 = vadd.s32 %v427_v63, %v423_v62 }
 0x256   :  { %v429_v2 = vadd.s32 536870912, %v428_v0 }
 0x258   :  { %v430_v21 = vshrl.u32 %v429_v2, 30 }
 0x25a   :  { %v431_v18 = vshll.u32 %v430_v21, 30  ;;  %v454_v26 = vsub.s32 4, %v430_v21 }
 0x25c   :  { %v432_v3 = vsub.s32 %v428_v0, %v431_v18  ;;  %v455_v29 = vsel %vm370_vm6, %v454_v26, %v430_v21 }
 0x25d   :  { %v457_v31 = vsel %vm369_vm7, 0, %v455_v29 }
 0x25e   :  { %v434_v4 = vsub.s32 0, %v432_v3  ;;  %v461_v32 = vadd.s32 3, %v457_v31 }
 0x260   :  { %v626_v5 = vmin.u32 %v434_v4, %v432_v3  ;;  %v462_v34 = vand.u32 3, %v461_v32 }
 0x262   :  { %v436_v6 = vclz %v626_v5  ;;  %vm467_vm8 = vcmp.eq.s32.totalorder %v462_v34, 2  ;;  %vm464_vm9 = vcmp.eq.s32.totalorder %v462_v34, 0  ;;  %vm463_vm10 = vcmp.lt.s32.totalorder %v462_v34, 2 }
 0x264   :  { %v627_v7 = vadd.s32 4294967294, %v436_v6 }
 0x266   :  { %vm628_vm5 = vcmp.lt.s32.totalorder %v627_v7, 0 }
 0x267   :  { %v439_v8 = vsel %vm628_vm5, 0, %v627_v7 }
 0x268   :  { %v440_v11 = vsub.s32 32, %v439_v8  ;;  %v444_v12 = vsub.s32 4294967266, %v439_v8  ;;  %v441_v14 = vshll.u32 %v432_v3, %v439_v8 }
 0x26a   :  { %v442_v1 = vshrl.u32 %v424_v9, %v440_v11  ;;  %v445_v15 = vadd.s32 127, %v444_v12 }
 0x26c   :  { %v443_v16 = vor.u32 %v442_v1, %v441_v14  ;;  %v446_v19 = vshll.u32 %v445_v15, 23 }
 0x26e   :  { %v447_v22 = vor.u32 4788187, %v446_v19  ;;  %v450_v24 = vcvt.s32.f32 %v443_v16 }
 0x270   :  { %v448_v23 = vand.u32 2147483647, %v447_v22 }
 0x272   :  { %v451_v25 = vmul.f32 %v450_v24, %v448_v23 }
 0x274   :  { %v452_v28 = vxor.u32 2147483648, %v451_v25 }
 0x276   :  { %v453_v17 = vsel %vm370_vm6, %v452_v28, %v451_v25 }
 0x277   :  { %v456_v30 = vsel %vm369_vm7, %v1031_v13, %v453_v17 }
 0x278   :  { %758 = vcosq.f32 %v456_v30 }
 0x279   :  { %760 = vsinq.f32 %v456_v30 }
 0x282   :  { %v759_v36 = vpop.eup %758 }
 0x283   :  { %v761_v37 = vpop.eup %760  ;;  %v468_v39 = vxor.u32 2147483648, %v759_v36 }
 0x284   :  { %v465_v40 = vxor.u32 2147483648, %v761_v37 }
 0x285   :  { %v469_v42 = vsel %vm467_vm8, %v468_v39, %v761_v37 }
 0x286   :  { %v466_v43 = vsel %vm464_vm9, %v759_v36, %v465_v40 }
 0x287   :  { %v470_v20 = vsel %vm463_vm10, %v466_v43, %v469_v42 }
 0x288   :  { %v471_v45 = vsel %vm460_vm11, nan, %v470_v20 }
 0x289   :  { %v472_v46 = vmul.f32 %v471_v45, %v471_v45 }
 0x28b   :  { %v473_v35 = vmul.f32 %v472_v46, %v252_v60 }
 0x28d   :  { %v474_v48 = vadd.f32 %v473_v35, %v1026_v10 }
 0x28f   :  { %v492_v38 = vpack.c.bf16 %v474_v48, %v474_v48 }
 0x291   :  { %710 = vmatmul.mubr.bf16.vlgmr.msra.gmra.mrb[4].mxu0 %v492_v38 }
 0x364   :  { %v581_v50 = vpop.f32.mrb[4].mxu0 }
 0x365   :  { %v582_v41 = vadd.f32 %v629_v49, %v581_v50  ;;  %v711_v51 = vpop.f32.mrb[5].mxu0 }
 0x366   :  { %v584_v13 = vpop.f32.mrb[6].mxu0 }
 0x367   :  { %v712_v44 = vpop.f32.mrb[7].mxu0  ;;  %588 = vst.msk [vmem:[#allocation7] sm:$0x3] %vm587_vm12, %v582_v41 }
 0x368   :  { %807 = shalt.err (!%p804_p3)
}
 0x369   :  { %s808_s7 = scalar_lea.hbm %s1089_s8, 32 }
 0x36a   :  { %p809_p4 = scmp.ne.s32.totalorder %s1089_s8, %s808_s7  ;;  %p812_p5 = scmp.lt.u32.totalorder %s808_s7, %s1089_s8 }
 0x36c   :  { %p814_p6 = pnand %p812_p5, %p809_p4 }
 0x36e   :  { %817 = shalt.err (!%p814_p6)
}
 0x36f   :  { %598 = dma.vmem_to_hbm [thread:$0]  %s596_s13, 32, %s1089_s8, [#allocation4]  }
 0x370   :  { %822 = dma.done.wait [#allocation4], 32  }
 0x371   :  { %823 = vsyncadd [#allocation4], 4294967264 }
 0x372   :  { %602 = vsyncpa [#allocation3], 1 }
 0x373   :  { %603 = vsyncpa [#allocation4], 1 }
 0x374   :  { %604 = vsyncpa [#allocation5], 1 }

// kernel: tpu_custom_call.1
= control target key start
LH: loop header
LB: loop body
LE: loop exit
PB: predicated region body
PF: predicated region fallthrough
CT: control target
= control target key end

     0   :  { %13 = vsyncpa [#allocation5], 0  ;;  %s1081_s0 = inlined_call_operand.vmem [shape: f32[2], index: 0, kind: input, shape index: {}]   ;;  %s1082_s1 = inlined_call_operand.vmem [shape: f32[2,64], index: 1, kind: input, shape index: {}]   ;;  %s1083_s2 = inlined_call_operand.hbm [shape: bf16[64,128], index: 2, kind: input, shape index: {}]   ;;  %s1084_s3 = inlined_call_operand.vmem [shape: f32[1,128], index: 3, kind: input, shape index: {}]   ;;  %s1085_s4 = inlined_call_operand.vmem [shape: bf16[128,128], index: 4, kind: input, shape index: {}]   ;;  %s1086_s5 = inlined_call_operand.vmem [shape: f32[1,128], index: 5, kind: input, shape index: {}]   ;;  %s1087_s6 = inlined_call_operand.vmem [shape: bf16[128,16], index: 6, kind: input, shape index: {}]   ;;  %s1088_s7 = inlined_call_operand.vmem [shape: f32[1,16], index: 7, kind: input, shape index: {}]   ;;  %s1089_s8 = inlined_call_operand.hbm [shape: f32[2,16], index: 8, kind: output, shape index: {}]  }
   0x1   :  { %14 = vsyncpa [#allocation3], 0 }
   0x2   :  { %15 = vsyncpa [#allocation4], 0  ;;  %s22_s29 = sshll.u32 %s1081_s0, 4  ;;  %s23_s29 = int_to_ptr.vmem [resolvable:$true] %s22_s29 }
   0x3   :  { %s762_s30 = scalar_lea.vmem %s23_s29, 16  ;;  %p767_p1 = scmp.lt.s32.totalorder %s23_s29, %s23_s29 }
   0x4   :  { %p763_p0 = scmp.ne.s32.totalorder %s23_s29, %s762_s30  ;;  %p768_p2 = scmp.lt.s32.totalorder %s762_s30, %s762_s30 }
   0x6   :  { %p769_p3 = por %p768_p2, %p767_p1 }
   0x8   :  { %p770_p4 = pnand %p769_p3, %p763_p0 }
   0xa   :  { %773 = shalt.err (!%p770_p4)
}
   0xb   :  { %s824_s9 = smov [#allocation2]   ;;  %s825_s10 = smov [#allocation6]  }
   0xc   :  { %25 = dma.vmem_to_smem %s23_s29, 16, %s824_s9, [#allocation5]  }
   0xd   :  { %s33_s11 = sshll.u32 %s825_s10, 4  ;;  %s774_s14 = scalar_lea.hbm %s1083_s2, 512  ;;  %s34_s11 = int_to_ptr.vmem [resolvable:$true] %s33_s11 }
   0xe   :  { %p775_p5 = scmp.ne.s32.totalorder %s1083_s2, %s774_s14  ;;  %p778_p6 = scmp.lt.u32.totalorder %s774_s14, %s1083_s2 }
  0x10   :  { %p780_p7 = pnand %p778_p6, %p775_p5 }
  0x12   :  { %783 = shalt.err (!%p780_p7)
}
  0x13   :  { %s784_s18 = scalar_lea.vmem %s34_s11, 512  ;;  %p789_p9 = scmp.lt.s32.totalorder %s34_s11, %s34_s11 }
  0x14   :  { %p785_p8 = scmp.ne.s32.totalorder %s34_s11, %s784_s18  ;;  %p790_p10 = scmp.lt.s32.totalorder %s784_s18, %s784_s18 }
  0x16   :  { %p791_p11 = por %p790_p10, %p789_p9 }
  0x18   :  { %p792_p12 = pnand %p791_p11, %p785_p8 }
  0x1a   :  { %795 = shalt.err (!%p792_p12)
}
  0x1b   :  { %s826_s19 = smov 64   ;;  %s827_s20 = smov 4  }
  0x1c   :  { %39 = dma.hbm_to_vmem [thread:$0]  %s1083_s2, 512, %s34_s11, [#allocation3], %s826_s19, %s826_s19, %s827_s20  }
  0x1d   :  { %818 = dma.done.wait [#allocation5], 16  }
  0x1e   :  { %819 = vsyncadd [#allocation5], 4294967280 }
  0x1f   :  { %820 = dma.done.wait [#allocation3], 512  }
  0x20   :  { %821 = vsyncadd [#allocation3], 4294966784 }
  0x21   :  { %56 = sfence }
  0x22   :  { %v734_v0 = vld [vmem:[#allocation6] sm:$0xff]   ;;  %v828_v1 = vmov 0.0   ;;  %v735_v2 = vld [vmem:[#allocation6 + $0x8] sm:$0xff]   ;;  %vm829_vm0 = vmmov 0   ;;  %v736_v3 = vld [vmem:[#allocation6 + $0x10] sm:$0xff]   ;;  %vm101_vm1 = vcmask 523264  }
  0x23   :  { %661 = vmatprep.subr.bf16.mxu0 %v828_v1  ;;  %673 = vmatprep.subr.bf16.mxu1 %v828_v1  ;;  %v737_v4 = vld [vmem:[#allocation6 + $0x18] sm:$0xff]   ;;  %v60_v5 = vld [vmem:[%s1082_s1] sm:$0x3]  ;;  %v739_v8 = vld [vmem:[%s1085_s4 + $0x8] sm:$0xff]   ;;  %s943_s0 = sld [smem:[#allocation2]]  ;;  %s836_s12 = smov [#allocation7]  }
  0x24   :  { %662 = vmatpush3.bf16.msra.mxu0 %v734_v0  ;;  %669 = vmatprep.mubr.msk.bf16.mxu0 %vm829_vm0, %v828_v1  ;;  %v70_v6 = vpack.c.bf16 %v60_v5, %v60_v5  ;;  %v738_v7 = vld [vmem:[%s1085_s4] sm:$0xff]   ;;  %v740_v9 = vld [vmem:[%s1085_s4 + $0x10] sm:$0xff]   ;;  %v741_v10 = vld [vmem:[%s1085_s4 + $0x18] sm:$0xff]   ;;  %v830_v33 = vmov 683565275   ;;  %s595_s13 = sshll.u32 %s836_s12, 4  ;;  %s596_s13 = int_to_ptr.vmem [resolvable:$true] %s595_s13 }
  0x25   :  { %663 = vmatprep.subr.bf16.mxu0 %v828_v1  ;;  %689 = vmatprep.mubr.msk.bf16.mxu1 %vm829_vm0, %v828_v1  ;;  %v742_v11 = vld [vmem:[%s1085_s4 + $0x20] sm:$0xff]   ;;  %v743_v12 = vld [vmem:[%s1085_s4 + $0x28] sm:$0xff]   ;;  %v744_v13 = vld [vmem:[%s1085_s4 + $0x30] sm:$0xff]   ;;  %v831_v35 = vmov 2475754826   ;;  %s796_s14 = scalar_lea.vmem %s596_s13, 32  ;;  %p801_p0 = scmp.lt.s32.totalorder %s596_s13, %s596_s13 }
  0x26   :  { %674 = vmatpush3.bf16.msra.mxu1 %v738_v7  ;;  %v745_v14 = vld [vmem:[%s1085_s4 + $0x38] sm:$0xff]   ;;  %v606_v15 = vld [vmem:[%s1084_s3] ss:$0 sm:$0xff]  ;;  %v832_v38 = vmov 2131351028   ;;  %s985_s3 = sld [smem:[#allocation2 + $0x1]]  ;;  %p797_p13 = scmp.ne.s32.totalorder %s596_s13, %s796_s14 }
  0x27   :  { %675 = vmatprep.subr.bf16.mxu1 %v828_v1  ;;  %v833_v41 = vmov 2102212464   ;;  %v834_v44 = vmov 920167782   ;;  %v835_v47 = vmov 1326507024   ;;  %p802_p1 = scmp.lt.s32.totalorder %s796_s14, %s796_s14 }
  0x28   :  { %664 = vmatpush3.bf16.msra.mxu0 %v735_v2 }
  0x29   :  { %665 = vmatprep.subr.bf16.mxu0 %v828_v1  ;;  %v145_v17 = vstv %s943_s0  ;;  %p803_p2 = por %p802_p1, %p801_p0 }
  0x2a   :  { %676 = vmatpush3.bf16.msra.mxu1 %v739_v8 }
  0x2b   :  { %677 = vmatprep.subr.bf16.mxu1 %v828_v1  ;;  %p804_p3 = pnand %p803_p2, %p797_p13 }
  0x2c   :  { %666 = vmatpush3.bf16.msra.mxu0 %v736_v3 }
  0x2d   :  { %667 = vmatprep.subr.bf16.mxu0 %v828_v1 }
  0x2e   :  { %678 = vmatpush3.bf16.msra.mxu1 %v740_v9 }
  0x2f   :  { %679 = vmatprep.subr.bf16.mxu1 %v828_v1 }
  0x30   :  { %668 = vmatpush3.bf16.msra.mxu0 %v737_v4 }
  0x31   :  { %693 = vmatprep.subr.bf16.mxu0 %v828_v1 }
  0x32   :  { %680 = vmatpush3.bf16.msra.mxu1 %v741_v10 }
  0x33   :  { %670 = vmatmul.mubr.msk.bf16.vlgmr.msra.gmra.mrb[0].mxu0 %vm101_vm1, %v70_v6  ;;  %681 = vmatprep.subr.bf16.mxu1 %v828_v1 }
  0x34   :  { %709 = vmatprep.mubr.msk.bf16.mxu0 %vm829_vm0, %v828_v1 }
  0x36   :  { %682 = vmatpush3.bf16.msra.mxu1 %v742_v11 }
  0x37   :  { %683 = vmatprep.subr.bf16.mxu1 %v828_v1 }
  0x3a   :  { %684 = vmatpush3.bf16.msra.mxu1 %v743_v12 }
  0x3b   :  { %685 = vmatprep.subr.bf16.mxu1 %v828_v1 }
  0x3e   :  { %686 = vmatpush3.bf16.msra.mxu1 %v744_v13 }
  0x3f   :  { %687 = vmatprep.subr.bf16.mxu1 %v828_v1 }
  0x42   :  { %688 = vmatpush3.bf16.msra.mxu1 %v745_v14 }
 0x106   :  { %v139_v16 = vpop.f32.mrb[0].mxu0 }
 0x107   :  { %v949_v18 = vadd.f32 %v606_v15, %v139_v16  ;;  %v671_v19 = vpop.f32.mrb[1].mxu0 }
 0x108   :  { %v142_v20 = vpop.f32.mrb[2].mxu0 }
 0x109   :  { %v954_v21 = vmul.f32 %v145_v17, %v949_v18  ;;  %v672_v22 = vpop.f32.mrb[3].mxu0 }
 0x10b   :  { %v150_v23 = vand.u32 2139095040, %v954_v21  ;;  %v147_v27 = vand.u32 2147483647, %v954_v21  ;;  %vm149_vm9 = vcmp.lt.s32.totalorder %v954_v21, 0  ;;  %vm239_vm14 = vweird.f32 %v954_v21 }
 0x10d   :  { %v151_v24 = vshrl.u32 %v150_v23, 23  ;;  %v154_v30 = vand.u32 8388607, %v147_v27  ;;  %vm148_vm10 = vcmp.le.f32.partialorder %v147_v27, 0.7853982 }
 0x10f   :  { %v612_v25 = vadd.s32 4294967169, %v151_v24  ;;  %v155_v49 = vor.u32 8388608, %v154_v30 }
 0x111   :  { %v157_v26 = vadd.s32 1, %v612_v25  ;;  %v195_v63 = vshll.u32 %v155_v49, 8 }
 0x113   :  { %vm158_vm2 = vcmp.gt.s32.totalorder %v157_v26, 0 }
 0x114   :  { %v159_v28 = vsel %vm158_vm2, %v157_v26, 0 }
 0x115   :  { %v161_v29 = vand.u32 31, %v159_v28  ;;  %v160_v32 = vshrl.u32 %v159_v28, 5 }
 0x117   :  { %v162_v31 = vsub.s32 32, %v161_v29  ;;  %v164_v34 = vshll.u32 %v830_v33, %v161_v29  ;;  %v167_v36 = vshll.u32 %v831_v35, %v161_v29  ;;  %v170_v40 = vshll.u32 %v832_v38, %v161_v29 }
 0x118   :  { %v173_v43 = vshll.u32 %v833_v41, %v161_v29  ;;  %v176_v46 = vshll.u32 %v834_v44, %v161_v29  ;;  %vm179_vm3 = vcmp.lt.s32.totalorder %v160_v32, 1  ;;  %vm182_vm4 = vcmp.lt.s32.totalorder %v160_v32, 4 }
 0x119   :  { %v165_v37 = vshrl.u32 %v831_v35, %v162_v31  ;;  %v168_v39 = vshrl.u32 %v832_v38, %v162_v31  ;;  %v171_v42 = vshrl.u32 %v833_v41, %v162_v31  ;;  %v174_v45 = vshrl.u32 %v834_v44, %v162_v31 }
 0x11a   :  { %v177_v48 = vshrl.u32 %v835_v47, %v162_v31  ;;  %v163_v58 = vshrl.u32 %v830_v33, %v162_v31  ;;  %vm181_vm5 = vcmp.lt.s32.totalorder %v160_v32, 3  ;;  %vm180_vm6 = vcmp.lt.s32.totalorder %v160_v32, 2 }
 0x11b   :  { %v166_v50 = vor.u32 %v165_v37, %v164_v34  ;;  %v169_v51 = vor.u32 %v168_v39, %v167_v36  ;;  %v172_v52 = vor.u32 %v171_v42, %v170_v40  ;;  %v175_v53 = vor.u32 %v174_v45, %v173_v43 }
 0x11c   :  { %v178_v54 = vor.u32 %v177_v48, %v176_v46 }
 0x11d   :  { %v184_v55 = vsel %vm182_vm4, %v172_v52, 2102212464  ;;  %v187_v56 = vsel %vm179_vm3, %v166_v50, %v169_v51  ;;  %v191_v57 = vsel %vm179_vm3, %v169_v51, %v172_v52  ;;  %v188_v59 = vsel %vm182_vm4, %v175_v53, 920167782 }
 0x11e   :  { %v192_v60 = vsel %vm182_vm4, %v178_v54, 1326507024  ;;  %v189_v61 = vsel %vm181_vm5, %v172_v52, %v188_v59  ;;  %v183_v0 = vsel %vm179_vm3, %v163_v58, %v166_v50  ;;  %v185_v2 = vsel %vm181_vm5, %v169_v51, %v184_v55 }
 0x11f   :  { %v193_v62 = vsel %vm181_vm5, %v175_v53, %v192_v60  ;;  %v190_v3 = vsel %vm180_vm6, %v187_v56, %v189_v61  ;;  %v186_v9 = vsel %vm180_vm6, %v183_v0, %v185_v2  ;;  %v252_v60 = vstv %s985_s3  ;;  %v746_v2 = vld [vmem:[%s1087_s6] sm:$0xff]  }
 0x120   :  { %v194_v4 = vsel %vm180_vm6, %v191_v57, %v193_v62  ;;  %v974_v7 = vmul.u32.u64.low %v195_v63, %v190_v3  ;;  %v975_v8 = vmul.u32.u64.high %v195_v63, %v190_v3, %v974_v7  ;;  %v202_v11 = vmul.u32 %v195_v63, %v186_v9  ;;  %694 = vmatpush3.bf16.msra.mxu0 %v746_v2  ;;  %v749_v3 = vld [vmem:[%s1087_s6 + $0x18] sm:$0xff]  }
 0x121   :  { %v971_v5 = vmul.u32.u64.low %v195_v63, %v194_v4  ;;  %v972_v6 = vmul.u32.u64.high %v195_v63, %v194_v4, %v971_v5  ;;  %695 = vmatprep.subr.bf16.mxu0 %v828_v1  ;;  %v750_v4 = vld [vmem:[%s1087_s6 + $0x20] sm:$0xff]  }
 0x122   :  { %v205_v10 = vadd.s32 1, %v975_v8  ;;  %v751_v5 = vld [vmem:[%s1087_s6 + $0x28] sm:$0xff]  }
 0x123   :  { %vm204_vm7 = vc.u32 %v972_v6, %v974_v7  ;;  %v203_v26 = vadd.s32 %v974_v7, %v972_v6  ;;  %v752_v6 = vld [vmem:[%s1087_s6 + $0x30] sm:$0xff]   ;;  %v753_v7 = vld [vmem:[%s1087_s6 + $0x38] sm:$0xff]  }
 0x124   :  { %v206_v12 = vsel %vm204_vm7, %v205_v10, %v975_v8  ;;  %v616_v8 = vld [vmem:[%s1086_s5] ss:$0 sm:$0xff] }
 0x125   :  { %v207_v13 = vadd.s32 %v206_v12, %v202_v11 }
 0x127   :  { %v208_v14 = vadd.s32 536870912, %v207_v13 }
 0x129   :  { %v209_v15 = vshrl.u32 %v208_v14, 30 }
 0x12b   :  { %v210_v16 = vshll.u32 %v209_v15, 30  ;;  %v233_v43 = vsub.s32 4, %v209_v15 }
 0x12d   :  { %v211_v19 = vsub.s32 %v207_v13, %v210_v16  ;;  %v234_v48 = vsel %vm149_vm9, %v233_v43, %v209_v15 }
 0x12e   :  { %v236_v50 = vsel %vm148_vm10, 0, %v234_v48 }
 0x12f   :  { %v213_v20 = vsub.s32 0, %v211_v19  ;;  %v240_v51 = vadd.s32 3, %v236_v50 }
 0x131   :  { %v613_v22 = vmin.u32 %v213_v20, %v211_v19  ;;  %v241_v52 = vand.u32 3, %v240_v51 }
 0x133   :  { %v215_v23 = vclz %v613_v22  ;;  %vm246_vm11 = vcmp.eq.s32.totalorder %v241_v52, 2  ;;  %vm243_vm12 = vcmp.eq.s32.totalorder %v241_v52, 0  ;;  %vm242_vm13 = vcmp.lt.s32.totalorder %v241_v52, 2 }
 0x135   :  { %v614_v24 = vadd.s32 4294967294, %v215_v23 }
 0x137   :  { %vm615_vm8 = vcmp.lt.s32.totalorder %v614_v24, 0 }
 0x138   :  { %v218_v25 = vsel %vm615_vm8, 0, %v614_v24 }
 0x139   :  { %v219_v28 = vsub.s32 32, %v218_v25  ;;  %v223_v29 = vsub.s32 4294967266, %v218_v25  ;;  %v220_v30 = vshll.u32 %v211_v19, %v218_v25 }
 0x13b   :  { %v221_v31 = vshrl.u32 %v203_v26, %v219_v28  ;;  %v224_v32 = vadd.s32 127, %v223_v29 }
 0x13d   :  { %v222_v34 = vor.u32 %v221_v31, %v220_v30  ;;  %v225_v36 = vshll.u32 %v224_v32, 23 }
 0x13f   :  { %v226_v37 = vor.u32 4788187, %v225_v36  ;;  %v229_v40 = vcvt.s32.f32 %v222_v34 }
 0x141   :  { %v227_v39 = vand.u32 2147483647, %v226_v37 }
 0x143   :  { %v230_v42 = vmul.f32 %v229_v40, %v227_v39 }
 0x145   :  { %v231_v45 = vxor.u32 2147483648, %v230_v42 }
 0x147   :  { %v232_v46 = vsel %vm149_vm9, %v231_v45, %v230_v42 }
 0x148   :  { %v235_v49 = vsel %vm148_vm10, %v954_v21, %v232_v46  ;;  %v747_v21 = vld [vmem:[%s1087_s6 + $0x8] sm:$0xff]  }
 0x149   :  { %754 = vcosq.f32 %v235_v49  ;;  %696 = vmatpush3.bf16.msra.mxu0 %v747_v21 }
 0x14a   :  { %756 = vsinq.f32 %v235_v49  ;;  %697 = vmatprep.subr.bf16.mxu0 %v828_v1 }
 0x153   :  { %v755_v53 = vpop.eup %754 }
 0x154   :  { %v757_v54 = vpop.eup %756  ;;  %v247_v55 = vxor.u32 2147483648, %v755_v53 }
 0x155   :  { %v244_v56 = vxor.u32 2147483648, %v757_v54 }
 0x156   :  { %v248_v27 = vsel %vm246_vm11, %v247_v55, %v757_v54 }
 0x157   :  { %v245_v57 = vsel %vm243_vm12, %v755_v53, %v244_v56  ;;  %vm587_vm12 = vcmask 123904  }
 0x158   :  { %v249_v58 = vsel %vm242_vm13, %v245_v57, %v248_v27 }
 0x159   :  { %v250_v59 = vsel %vm239_vm14, nan, %v249_v58 }
 0x15a   :  { %v251_v61 = vmul.f32 %v250_v59, %v250_v59 }
 0x15c   :  { %v253_v62 = vmul.f32 %v252_v60, %v251_v61 }
 0x15e   :  { %v254_v63 = vadd.f32 %v253_v62, %v949_v18  ;;  %v748_v18 = vld [vmem:[%s1087_s6 + $0x10] sm:$0xff]  }
 0x15f   :  { %698 = vmatpush3.bf16.msra.mxu0 %v748_v18 }
 0x160   :  { %v272_v0 = vpack.c.bf16 %v254_v63, %v254_v63  ;;  %699 = vmatprep.subr.bf16.mxu0 %v828_v1 }
 0x162   :  { %690 = vmatmul.mubr.bf16.vlgmr.msra.gmra.mrb[0].mxu1 %v272_v0 }
 0x163   :  { %700 = vmatpush3.bf16.msra.mxu0 %v749_v3 }
 0x164   :  { %701 = vmatprep.subr.bf16.mxu0 %v828_v1 }
 0x167   :  { %702 = vmatpush3.bf16.msra.mxu0 %v750_v4 }
 0x168   :  { %703 = vmatprep.subr.bf16.mxu0 %v828_v1 }
 0x16b   :  { %704 = vmatpush3.bf16.msra.mxu0 %v751_v5 }
 0x16c   :  { %705 = vmatprep.subr.bf16.mxu0 %v828_v1 }
 0x16f   :  { %706 = vmatpush3.bf16.msra.mxu0 %v752_v6 }
 0x170   :  { %707 = vmatprep.subr.bf16.mxu0 %v828_v1 }
 0x173   :  { %708 = vmatpush3.bf16.msra.mxu0 %v753_v7 }
 0x235   :  { %v361_v9 = vpop.f32.mrb[0].mxu1 }
 0x236   :  { %v1026_v10 = vadd.f32 %v616_v8, %v361_v9  ;;  %v691_v11 = vpop.f32.mrb[1].mxu1 }
 0x237   :  { %v364_v12 = vpop.f32.mrb[2].mxu1 }
 0x238   :  { %v1031_v13 = vmul.f32 %v1026_v10, %v145_v17  ;;  %v692_v14 = vpop.f32.mrb[3].mxu1 }
 0x23a   :  { %v371_v1 = vand.u32 2139095040, %v1031_v13  ;;  %v368_v20 = vand.u32 2147483647, %v1031_v13  ;;  %vm370_vm6 = vcmp.lt.s32.totalorder %v1031_v13, 0  ;;  %vm460_vm11 = vweird.f32 %v1031_v13 }
 0x23c   :  { %v372_v15 = vshrl.u32 %v371_v1, 23  ;;  %v375_v24 = vand.u32 8388607, %v368_v20  ;;  %vm369_vm7 = vcmp.le.f32.partialorder %v368_v20, 0.7853982 }
 0x23e   :  { %v625_v16 = vadd.s32 4294967169, %v372_v15  ;;  %v376_v40 = vor.u32 8388608, %v375_v24 }
 0x240   :  { %v378_v19 = vadd.s32 1, %v625_v16 }
 0x242   :  { %vm379_vm15 = vcmp.gt.s32.totalorder %v378_v19, 0 }
 0x243   :  { %v380_v22 = vsel %vm379_vm15, %v378_v19, 0 }
 0x244   :  { %v382_v23 = vand.u32 31, %v380_v22  ;;  %v381_v26 = vshrl.u32 %v380_v22, 5 }
 0x246   :  { %v383_v25 = vsub.s32 32, %v382_v23  ;;  %v385_v28 = vshll.u32 %v830_v33, %v382_v23  ;;  %v388_v17 = vshll.u32 %v831_v35, %v382_v23  ;;  %v391_v31 = vshll.u32 %v832_v38, %v382_v23 }
 0x247   :  { %v394_v34 = vshll.u32 %v833_v41, %v382_v23  ;;  %v397_v37 = vshll.u32 %v834_v44, %v382_v23  ;;  %vm400_vm0 = vcmp.lt.s32.totalorder %v381_v26, 1  ;;  %vm403_vm1 = vcmp.lt.s32.totalorder %v381_v26, 4 }
 0x248   :  { %v386_v29 = vshrl.u32 %v831_v35, %v383_v25  ;;  %v389_v30 = vshrl.u32 %v832_v38, %v383_v25  ;;  %v392_v32 = vshrl.u32 %v833_v41, %v383_v25  ;;  %v395_v36 = vshrl.u32 %v834_v44, %v383_v25 }
 0x249   :  { %v398_v39 = vshrl.u32 %v835_v47, %v383_v25  ;;  %v384_v50 = vshrl.u32 %v830_v33, %v383_v25  ;;  %vm402_vm2 = vcmp.lt.s32.totalorder %v381_v26, 3  ;;  %vm401_vm3 = vcmp.lt.s32.totalorder %v381_v26, 2 }
 0x24a   :  { %v387_v42 = vor.u32 %v386_v29, %v385_v28  ;;  %v390_v43 = vor.u32 %v389_v30, %v388_v17  ;;  %v393_v45 = vor.u32 %v392_v32, %v391_v31  ;;  %v396_v46 = vor.u32 %v395_v36, %v394_v34 }
 0x24b   :  { %v399_v35 = vor.u32 %v398_v39, %v397_v37  ;;  %v416_v47 = vshll.u32 %v376_v40, 8 }
 0x24c   :  { %v405_v48 = vsel %vm403_vm1, %v393_v45, 2102212464  ;;  %v408_v38 = vsel %vm400_vm0, %v387_v42, %v390_v43  ;;  %v412_v49 = vsel %vm400_vm0, %v390_v43, %v393_v45  ;;  %v409_v41 = vsel %vm403_vm1, %v396_v46, 920167782 }
 0x24d   :  { %v413_v51 = vsel %vm403_vm1, %v399_v35, 1326507024  ;;  %v410_v44 = vsel %vm402_vm2, %v393_v45, %v409_v41  ;;  %v404_v53 = vsel %vm400_vm0, %v384_v50, %v387_v42  ;;  %v406_v54 = vsel %vm402_vm2, %v390_v43, %v405_v48 }
 0x24e   :  { %v414_v52 = vsel %vm402_vm2, %v396_v46, %v413_v51  ;;  %v411_v55 = vsel %vm401_vm3, %v408_v38, %v410_v44  ;;  %v407_v61 = vsel %vm401_vm3, %v404_v53, %v406_v54 }
 0x24f   :  { %v415_v56 = vsel %vm401_vm3, %v412_v49, %v414_v52  ;;  %v1051_v58 = vmul.u32.u64.low %v416_v47, %v411_v55  ;;  %v1052_v59 = vmul.u32.u64.high %v416_v47, %v411_v55, %v1051_v58  ;;  %v423_v62 = vmul.u32 %v416_v47, %v407_v61  ;;  %v629_v49 = vld [vmem:[%s1088_s7] ss:$0 sm:$0xff] }
 0x250   :  { %v1048_v27 = vmul.u32.u64.low %v416_v47, %v415_v56  ;;  %v1049_v57 = vmul.u32.u64.high %v416_v47, %v415_v56, %v1048_v27 }
 0x251   :  { %v426_v33 = vadd.s32 1, %v1052_v59 }
 0x252   :  { %vm425_vm4 = vc.u32 %v1049_v57, %v1051_v58  ;;  %v424_v9 = vadd.s32 %v1051_v58, %v1049_v57 }
 0x253   :  { %v427_v63 = vsel %vm425_vm4, %v426_v33, %v1052_v59 }
 0x254   :  { %v428_v0 = vadd.s32 %v427_v63, %v423_v62 }
 0x256   :  { %v429_v2 = vadd.s32 536870912, %v428_v0 }
 0x258   :  { %v430_v21 = vshrl.u32 %v429_v2, 30 }
 0x25a   :  { %v431_v18 = vshll.u32 %v430_v21, 30  ;;  %v454_v26 = vsub.s32 4, %v430_v21 }
 0x25c   :  { %v432_v3 = vsub.s32 %v428_v0, %v431_v18  ;;  %v455_v29 = vsel %vm370_vm6, %v454_v26, %v430_v21 }
 0x25d   :  { %v457_v31 = vsel %vm369_vm7, 0, %v455_v29 }
 0x25e   :  { %v434_v4 = vsub.s32 0, %v432_v3  ;;  %v461_v32 = vadd.s32 3, %v457_v31 }
 0x260   :  { %v626_v5 = vmin.u32 %v434_v4, %v432_v3  ;;  %v462_v34 = vand.u32 3, %v461_v32 }
 0x262   :  { %v436_v6 = vclz %v626_v5  ;;  %vm467_vm8 = vcmp.eq.s32.totalorder %v462_v34, 2  ;;  %vm464_vm9 = vcmp.eq.s32.totalorder %v462_v34, 0  ;;  %vm463_vm10 = vcmp.lt.s32.totalorder %v462_v34, 2 }
 0x264   :  { %v627_v7 = vadd.s32 4294967294, %v436_v6 }
 0x266   :  { %vm628_vm5 = vcmp.lt.s32.totalorder %v627_v7, 0 }
 0x267   :  { %v439_v8 = vsel %vm628_vm5, 0, %v627_v7 }
 0x268   :  { %v440_v11 = vsub.s32 32, %v439_v8  ;;  %v444_v12 = vsub.s32 4294967266, %v439_v8  ;;  %v441_v14 = vshll.u32 %v432_v3, %v439_v8 }
 0x26a   :  { %v442_v1 = vshrl.u32 %v424_v9, %v440_v11  ;;  %v445_v15 = vadd.s32 127, %v444_v12 }
 0x26c   :  { %v443_v16 = vor.u32 %v442_v1, %v441_v14  ;;  %v446_v19 = vshll.u32 %v445_v15, 23 }
 0x26e   :  { %v447_v22 = vor.u32 4788187, %v446_v19  ;;  %v450_v24 = vcvt.s32.f32 %v443_v16 }
 0x270   :  { %v448_v23 = vand.u32 2147483647, %v447_v22 }
 0x272   :  { %v451_v25 = vmul.f32 %v450_v24, %v448_v23 }
 0x274   :  { %v452_v28 = vxor.u32 2147483648, %v451_v25 }
 0x276   :  { %v453_v17 = vsel %vm370_vm6, %v452_v28, %v451_v25 }
 0x277   :  { %v456_v30 = vsel %vm369_vm7, %v1031_v13, %v453_v17 }
 0x278   :  { %758 = vcosq.f32 %v456_v30 }
 0x279   :  { %760 = vsinq.f32 %v456_v30 }
 0x282   :  { %v759_v36 = vpop.eup %758 }
 0x283   :  { %v761_v37 = vpop.eup %760  ;;  %v468_v39 = vxor.u32 2147483648, %v759_v36 }
 0x284   :  { %v465_v40 = vxor.u32 2147483648, %v761_v37 }
 0x285   :  { %v469_v42 = vsel %vm467_vm8, %v468_v39, %v761_v37 }
 0x286   :  { %v466_v43 = vsel %vm464_vm9, %v759_v36, %v465_v40 }
 0x287   :  { %v470_v20 = vsel %vm463_vm10, %v466_v43, %v469_v42 }
 0x288   :  { %v471_v45 = vsel %vm460_vm11, nan, %v470_v20 }
 0x289   :  { %v472_v46 = vmul.f32 %v471_v45, %v471_v45 }
 0x28b   :  { %v473_v35 = vmul.f32 %v472_v46, %v252_v60 }
 0x28d   :  { %v474_v48 = vadd.f32 %v473_v35, %v1026_v10 }
 0x28f   :  { %v492_v38 = vpack.c.bf16 %v474_v48, %v474_v48 }
 0x291   :  { %710 = vmatmul.mubr.bf16.vlgmr.msra.gmra.mrb[4].mxu0 %v492_v38 }
 0x364   :  { %v581_v50 = vpop.f32.mrb[4].mxu0 }
 0x365   :  { %v582_v41 = vadd.f32 %v629_v49, %v581_v50  ;;  %v711_v51 = vpop.f32.mrb[5].mxu0 }
 0x366   :  { %v584_v13 = vpop.f32.mrb[6].mxu0 }
 0x367   :  { %v712_v44 = vpop.f32.mrb[7].mxu0  ;;  %588 = vst.msk [vmem:[#allocation7] sm:$0x3] %vm587_vm12, %v582_v41 }
 0x368   :  { %807 = shalt.err (!%p804_p3)
}
 0x369   :  { %s808_s7 = scalar_lea.hbm %s1089_s8, 32 }
 0x36a   :  { %p809_p4 = scmp.ne.s32.totalorder %s1089_s8, %s808_s7  ;;  %p812_p5 = scmp.lt.u32.totalorder %s808_s7, %s1089_s8 }
 0x36c   :  { %p814_p6 = pnand %p812_p5, %p809_p4 }
 0x36e   :  { %817 = shalt.err (!%p814_p6)
}
 0x36f   :  { %598 = dma.vmem_to_hbm [thread:$0]  %s596_s13, 32, %s1089_s8, [#allocation4]  }
 0x370   :  { %822 = dma.done.wait [#allocation4], 32  }
 0x371   :  { %823 = vsyncadd [#allocation4], 4294967264 }
 0x372   :  { %602 = vsyncpa [#allocation3], 1 }
 0x373   :  { %603 = vsyncpa [#allocation4], 1 }
 0x374   :  { %604 = vsyncpa [#allocation5], 1 }

</bundles_post_ra>
